<compile_context>
chip_gen: v5e
topology: v5e:2x2
jax: 0.10.0
libtpu: 0.0.40
codegen_flags: <defaults>
</compile_context>

<pallas_src>
import functools

import jax
import jax.numpy as jnp
from jax.experimental import pallas as pl
from jax.experimental.pallas import tpu as pltpu

_NEG_BIG = -1e30  # bias of padded vocab columns: exp(pad - max) == 0 exactly


# ---------------------------------------------------------------------------
# Tile selection / VMEM budgeting.
# ---------------------------------------------------------------------------

def _round_up(x, m):
    return ((x + m - 1) // m) * m


def _tiles_and_vmem(N, H, V, E, in_itemsize):
    """Pick (tn, tv) and a VMEM limit from a simple double-buffer byte budget."""
    # Vocab tile: ~8 MiB double-buffered weight tile, lane aligned (x128).
    tv = (8 * 2**20) // max(1, 2 * H * in_itemsize)
    tv = max(128, min(4096, (tv // 128) * 128))
    tv = min(tv, _round_up(V, 128))
    # Token tile: ~8 MiB double-buffered f32 output tile, sublane aligned (x8).
    # Large tn minimizes how many times the E*H*V weights are re-streamed
    # (once per N tile).
    tn = (8 * 2**20) // max(1, 2 * tv * 4)
    tn = max(8, min(1024, (tn // 8) * 8))
    tn = min(tn, _round_up(N, 8))
    est = (2 * H * tv * in_itemsize        # weight tile (double buffered)
           + 2 * tn * H * in_itemsize      # hidden tile (double buffered)
           + 2 * tv * 4                    # bias tile
           + 2 * tn * tv * 4               # output tile
           + (2 * E + 2) * tn * 128 * 4)   # lse scratch / corr (lane padded)
    vmem_limit = int(min(max(1.25 * est, 32 * 2**20), 64 * 2**20))
    return tn, tv, vmem_limit


# ---------------------------------------------------------------------------
# Kernel 1 (default path, single weight pass per N tile):
#   grid = (N_tiles, V_tiles, E), E innermost.
#   outputs: mean_e logits (tiled over N, V) and corr[n] = mean_e lse_e[n].
# ---------------------------------------------------------------------------

def _make_sum_kernel(num_models):
    inv_e = 1.0 / num_models

    def kernel(h_ref, w_ref, b_ref, sum_ref, corr_ref, m_scr, s_scr):
        v_idx = pl.program_id(1)
        e_idx = pl.program_id(2)
        n_v = pl.num_programs(1)
        n_e = pl.num_programs(2)

        # Native dtype (e.g. bf16) straight to the MXU, f32 accumulation.
        logits = jnp.dot(h_ref[...], w_ref[...],
                         preferred_element_type=jnp.float32) + b_ref[...]

        # ---- ensemble sum of raw logits, accumulated in the resident block.
        @pl.when(e_idx == 0)
        def _():
            sum_ref[...] = logits

        @pl.when(e_idx > 0)
        def _():
            sum_ref[...] = sum_ref[...] + logits

        # 1/E scaling folded into the kernel (VPU work hidden under the MXU),
        # so the XLA epilogue is a single fused subtraction.
        @pl.when(e_idx == n_e - 1)
        def _():
            sum_ref[...] = sum_ref[...] * inv_e

        # ---- streaming (online) log-sum-exp per model / per row over V tiles.
        @pl.when(v_idx == 0)
        def _():
            m_scr[e_idx] = jnp.full(m_scr.shape[1:], -jnp.inf, jnp.float32)
            s_scr[e_idx] = jnp.zeros(s_scr.shape[1:], jnp.float32)

        m_old = m_scr[e_idx]
        m_new = jnp.maximum(m_old, jnp.max(logits, axis=-1, keepdims=True))
        s_scr[e_idx] = (s_scr[e_idx] * jnp.exp(m_old - m_new)
                        + jnp.sum(jnp.exp(logits - m_new), axis=-1,
                                  keepdims=True))
        m_scr[e_idx] = m_new

        # ---- after the last (v, e) step every model's normalizer is known.
        @pl.when((v_idx == n_v - 1) & (e_idx == n_e - 1))
        def _():
            lse_all = m_scr[...] + jnp.log(s_scr[...])        # (E, tn, 1)
            corr_ref[...] = jnp.sum(lse_all, axis=0) * inv_e  # (tn, 1)

    return kernel


# ---------------------------------------------------------------------------
# Kernels for raw_probs=True (two weight passes).
# ---------------------------------------------------------------------------

def _lse_kernel(h_ref, w_ref, b_ref, lse_ref, m_scr, s_scr):
    # grid = (N_tiles, E, V_tiles), V innermost reduction.
    v_idx = pl.program_id(2)

    logits = jnp.dot(h_ref[...], w_ref[...],
                     preferred_element_type=jnp.float32) + b_ref[...]

    @pl.when(v_idx == 0)
    def _():
        m_scr[...] = jnp.full(m_scr.shape, -jnp.inf, jnp.float32)
        s_scr[...] = jnp.zeros(s_scr.shape, jnp.float32)

    m_old = m_scr[...]
    m_new = jnp.maximum(m_old, jnp.max(logits, axis=-1, keepdims=True))
    s_scr[...] = (s_scr[...] * jnp.exp(m_old - m_new)
                  + jnp.sum(jnp.exp(logits - m_new), axis=-1, keepdims=True))
    m_scr[...] = m_new

    @pl.when(v_idx == pl.num_programs(2) - 1)
    def _():
        lse_ref[0] = m_scr[...] + jnp.log(s_scr[...])


def _make_prob_acc_kernel(num_models):
    inv_e = 1.0 / num_models

    def kernel(lse_ref, h_ref, w_ref, b_ref, o_ref):
        # grid = (N_tiles, V_tiles, E), E innermost; accumulate into o_ref.
        e_idx = pl.program_id(2)

        logits = jnp.dot(h_ref[...], w_ref[...],
                         preferred_element_type=jnp.float32) + b_ref[...]
        probs = jnp.exp(logits - lse_ref[0])     # softmax_e tile, (tn, tv)

        @pl.when(e_idx == 0)
        def _():
            o_ref[...] = probs

        @pl.when(e_idx > 0)
        def _():
            o_ref[...] = o_ref[...] + probs

        @pl.when(e_idx == pl.num_programs(2) - 1)
        def _():
            o_ref[...] = jnp.log(o_ref[...] * inv_e)

    return kernel


# ---------------------------------------------------------------------------
# Wrapper.
# ---------------------------------------------------------------------------

@functools.partial(jax.jit, static_argnames=("raw_probs",))
def ensemble_generator(hidden, weights, biases, raw_probs=False):
    """
    hidden:  [E, N, H]  per-model decoder hidden states (bf16 recommended)
    weights: [E, H, V]  per-model generator weight (H x V layout)
    biases:  [E, V]     per-model generator bias
    returns: [N, V]     averaged target log-distribution (float32)
    """
    E, N, H = hidden.shape
    V = weights.shape[-1]
    in_itemsize = jnp.dtype(hidden.dtype).itemsize
    tn, tv, vmem_limit = _tiles_and_vmem(N, H, V, E, in_itemsize)
    Np, Vp = _round_up(N, tn), _round_up(V, tv)

    bias3 = biases.reshape(E, 1, V).astype(jnp.float32)
    if Vp != V:
        # Padded columns: weight 0, bias -1e30 -> exp underflows to exactly 0,
        # so the online lse and the probability sums are unaffected.
        weights = jnp.pad(weights, ((0, 0), (0, 0), (0, Vp - V)))
        bias3 = jnp.pad(bias3, ((0, 0), (0, 0), (0, Vp - V)),
                        constant_values=_NEG_BIG)
    if Np != N:
        hidden = jnp.pad(hidden, ((0, 0), (0, Np - N), (0, 0)))

    n_t, v_t = Np // tn, Vp // tv

    # BlockSpecs shared by the (n, v, e)-grid kernels. Leading E dim squeezed.
    h_spec = pl.BlockSpec((None, tn, H), lambda n, v, e: (e, n, 0))
    w_spec = pl.BlockSpec((None, H, tv), lambda n, v, e: (e, 0, v))
    b_spec = pl.BlockSpec((None, 1, tv), lambda n, v, e: (e, 0, v))
    o_spec = pl.BlockSpec((tn, tv), lambda n, v, e: (n, v))

    compiler_params = pltpu.CompilerParams(
        dimension_semantics=("parallel", "arbitrary", "arbitrary"),
        vmem_limit_bytes=vmem_limit,
    )

    if not raw_probs:
        mean_logits, corr = pl.pallas_call(
            _make_sum_kernel(E),
            out_shape=(jax.ShapeDtypeStruct((Np, Vp), jnp.float32),
                       jax.ShapeDtypeStruct((Np, 1), jnp.float32)),
            grid_spec=pltpu.PrefetchScalarGridSpec(
                num_scalar_prefetch=0,
                grid=(n_t, v_t, E),
                in_specs=[h_spec, w_spec, b_spec],
                out_specs=(o_spec,
                           pl.BlockSpec((tn, 1), lambda n, v, e: (n, 0))),
                scratch_shapes=[pltpu.VMEM((E, tn, 1), jnp.float32),
                                pltpu.VMEM((E, tn, 1), jnp.float32)]),
            compiler_params=compiler_params,
        )(hidden, weights, bias3)
        # Tiny fused epilogue: mean_e logp_e = mean_e logits_e - mean_e lse_e.
        return (mean_logits - corr)[:N, :V]

    # raw_probs=True: log(mean_e softmax_e). Per-model normalizers must be
    # known before the per-element exp, so the weights are streamed twice.
    lse = pl.pallas_call(
        _lse_kernel,
        out_shape=jax.ShapeDtypeStruct((E, Np, 1), jnp.float32),
        grid_spec=pltpu.PrefetchScalarGridSpec(
            num_scalar_prefetch=0,
            grid=(n_t, E, v_t),
            in_specs=[pl.BlockSpec((None, tn, H), lambda n, e, v: (e, n, 0)),
                      pl.BlockSpec((None, H, tv), lambda n, e, v: (e, 0, v)),
                      pl.BlockSpec((None, 1, tv), lambda n, e, v: (e, 0, v))],
            out_specs=pl.BlockSpec((1, tn, 1), lambda n, e, v: (e, n, 0)),
            scratch_shapes=[pltpu.VMEM((tn, 1), jnp.float32),
                            pltpu.VMEM((tn, 1), jnp.float32)]),
        compiler_params=pltpu.CompilerParams(
            dimension_semantics=("parallel", "arbitrary", "arbitrary"),
            vmem_limit_bytes=vmem_limit),
    )(hidden, weights, bias3)

    out = pl.pallas_call(
        _make_prob_acc_kernel(E),
        out_shape=jax.ShapeDtypeStruct((Np, Vp), jnp.float32),
        grid_spec=pltpu.PrefetchScalarGridSpec(
            num_scalar_prefetch=0,
            grid=(n_t, v_t, E),
            in_specs=[pl.BlockSpec((1, tn, 1), lambda n, v, e: (e, n, 0)),
                      h_spec, w_spec, b_spec],
            out_specs=o_spec),
        compiler_params=compiler_params,
    )(lse, hidden, weights, bias3)
    return out[:N, :V]


# ---------------------------------------------------------------------------
# Pure-JAX reference + demo.
# ---------------------------------------------------------------------------

def _reference(hidden, weights, biases, raw_probs=False):
    logits = jnp.einsum("enh,ehv->env",
                        hidden.astype(jnp.float32),
                        weights.astype(jnp.float32)) + \
        biases[:, None, :].astype(jnp.float32)
    logp = jax.nn.log_softmax(logits, axis=-1)
    if raw_probs:
        return jnp.log(jnp.mean(jnp.exp(logp), axis=0))
    return jnp.mean(logp, axis=0)


if __name__ == "__main__":
    # Small deterministic shapes: 3 ensemble members, batch=2, seq=8,
    # hidden=32, vocab=128.
    E, B, T, H, V = 3, 2, 8, 32, 128
    N = B * T

    key = jax.random.PRNGKey(0)
    k_h, k_w, k_b = jax.random.split(key, 3)

    # bf16 operands feed the MXU directly (f32 accumulation in-kernel).
    hidden = jax.random.normal(k_h, (E, N, H), dtype=jnp.float32)
    hidden = hidden.astype(jnp.bfloat16)
    weights = (jax.random.normal(k_w, (E, H, V), dtype=jnp.float32) * 0.05)
    weights = weights.astype(jnp.bfloat16)
    biases = jax.random.normal(k_b, (E, V), dtype=jnp.float32) * 0.05

    # Default path: mean of per-model log-softmax distributions.
    out = ensemble_generator(hidden, weights, biases, raw_probs=False)
    out = jax.block_until_ready(out)
    ref = _reference(hidden, weights, biases, raw_probs=False)
    assert out.shape == (N, V)
    assert jnp.allclose(out, ref, atol=1e-4, rtol=1e-4), \
        float(jnp.max(jnp.abs(out - ref)))

    # raw_probs=True path: log of mean probabilities.
    out_raw = ensemble_generator(hidden, weights, biases, raw_probs=True)
    out_raw = jax.block_until_ready(out_raw)
    ref_raw = _reference(hidden, weights, biases, raw_probs=True)
    assert jnp.allclose(out_raw, ref_raw, atol=1e-4, rtol=1e-4), \
        float(jnp.max(jnp.abs(out_raw - ref_raw)))

    print("KERNEL_OK")
</pallas_src>

<mosaic_0001>
module attributes {stable_mosaic.version = 11 : i64} {
  func.func @kernel(%arg0: i32, %arg1: i32, %arg2: i32, %arg3: memref<1x16x32xbf16, #tpu.memory_space<vmem>>, %arg4: memref<1x32x128xbf16, #tpu.memory_space<vmem>>, %arg5: memref<1x1x128xf32, #tpu.memory_space<vmem>>, %arg6: memref<16x128xf32, #tpu.memory_space<vmem>>, %arg7: memref<16x1xf32, #tpu.memory_space<vmem>>, %arg8: memref<3x16x1xf32, #tpu.memory_space<vmem>>, %arg9: memref<3x16x1xf32, #tpu.memory_space<vmem>>) attributes {dimension_semantics = [#tpu.dimension_semantics<parallel>, #tpu.dimension_semantics<arbitrary>, #tpu.dimension_semantics<arbitrary>], iteration_bounds = array<i64: 1, 1, 3>, scalar_prefetch = 0 : i64, scratch_operands = 2 : i64, tpu.core_type = #tpu.core_type<tc>, window_params = [{transform_indices = @transform_0, window_bounds = array<i64: 1, 16, 32>}, {transform_indices = @transform_1, window_bounds = array<i64: 1, 32, 128>}, {transform_indices = @transform_2, window_bounds = array<i64: 1, 1, 128>}, {transform_indices = @transform_3, window_bounds = array<i64: 16, 128>}, {transform_indices = @transform_4, window_bounds = array<i64: 16, 1>}]} {
    %c0 = arith.constant 0 : index
    %c0_0 = arith.constant 0 : index
    %c0_1 = arith.constant 0 : index
    %0 = vector.load %arg3[%c0, %c0_0, %c0_1] : memref<1x16x32xbf16, #tpu.memory_space<vmem>>, vector<1x16x32xbf16>
    %1 = vector.shape_cast %0 : vector<1x16x32xbf16> to vector<16x32xbf16>
    %c0_2 = arith.constant 0 : index
    %c0_3 = arith.constant 0 : index
    %c0_4 = arith.constant 0 : index
    %2 = vector.load %arg4[%c0_2, %c0_3, %c0_4] : memref<1x32x128xbf16, #tpu.memory_space<vmem>>, vector<1x32x128xbf16>
    %3 = vector.shape_cast %2 : vector<1x32x128xbf16> to vector<32x128xbf16>
    %cst = arith.constant dense<0.000000e+00> : vector<16x128xf32>
    %4 = tpu.matmul %1, %3, %cst {dimension_numbers = #tpu.dot_dimension_numbers<[1], [0], [0], [1], [0, 0, 1, 1], [], []>} : vector<16x32xbf16>, vector<32x128xbf16>, vector<16x128xf32> -> vector<16x128xf32>
    %c0_5 = arith.constant 0 : index
    %c0_6 = arith.constant 0 : index
    %c0_7 = arith.constant 0 : index
    %5 = vector.load %arg5[%c0_5, %c0_6, %c0_7] : memref<1x1x128xf32, #tpu.memory_space<vmem>>, vector<1x1x128xf32>
    %6 = vector.shape_cast %5 : vector<1x1x128xf32> to vector<1x128xf32>
    %7 = vector.broadcast %6 : vector<1x128xf32> to vector<16x128xf32>
    %8 = arith.addf %4, %7 : vector<16x128xf32>
    %c0_i32 = arith.constant 0 : i32
    %9 = arith.cmpi eq, %arg2, %c0_i32 : i32
    %10 = arith.extui %9 : i1 to i32
    %c0_i32_8 = arith.constant 0 : i32
    %11 = arith.cmpi ne, %10, %c0_i32_8 : i32
    scf.if %11 {
      %c0_27 = arith.constant 0 : index
      %c0_28 = arith.constant 0 : index
      %52 = vector.load %arg6[%c0_27, %c0_28] : memref<16x128xf32, #tpu.memory_space<vmem>>, vector<16x128xf32>
      tpu.vector_store %arg6[%c0_27, %c0_28], %8 {strides = array<i32>} : memref<16x128xf32, #tpu.memory_space<vmem>>, vector<16x128xf32>,
    } else {
    }
    %c0_i32_9 = arith.constant 0 : i32
    %12 = arith.cmpi sgt, %arg2, %c0_i32_9 : i32
    %13 = arith.extui %12 : i1 to i32
    %c0_i32_10 = arith.constant 0 : i32
    %14 = arith.cmpi ne, %13, %c0_i32_10 : i32
    scf.if %14 {
      %c0_27 = arith.constant 0 : index
      %c0_28 = arith.constant 0 : index
      %52 = vector.load %arg6[%c0_27, %c0_28] : memref<16x128xf32, #tpu.memory_space<vmem>>, vector<16x128xf32>
      %53 = arith.addf %52, %8 : vector<16x128xf32>
      %c0_29 = arith.constant 0 : index
      %c0_30 = arith.constant 0 : index
      %54 = vector.load %arg6[%c0_29, %c0_30] : memref<16x128xf32, #tpu.memory_space<vmem>>, vector<16x128xf32>
      tpu.vector_store %arg6[%c0_29, %c0_30], %53 {strides = array<i32>} : memref<16x128xf32, #tpu.memory_space<vmem>>, vector<16x128xf32>,
    } else {
    }
    %c2_i32 = arith.constant 2 : i32
    %15 = arith.cmpi eq, %arg2, %c2_i32 : i32
    %16 = arith.extui %15 : i1 to i32
    %c0_i32_11 = arith.constant 0 : i32
    %17 = arith.cmpi ne, %16, %c0_i32_11 : i32
    scf.if %17 {
      %c0_27 = arith.constant 0 : index
      %c0_28 = arith.constant 0 : index
      %52 = vector.load %arg6[%c0_27, %c0_28] : memref<16x128xf32, #tpu.memory_space<vmem>>, vector<16x128xf32>
      %cst_29 = arith.constant 0.333333343 : f32
      %53 = vector.broadcast %cst_29 : f32 to vector<16x128xf32>
      %54 = arith.mulf %52, %53 : vector<16x128xf32>
      %c0_30 = arith.constant 0 : index
      %c0_31 = arith.constant 0 : index
      %55 = vector.load %arg6[%c0_30, %c0_31] : memref<16x128xf32, #tpu.memory_space<vmem>>, vector<16x128xf32>
      tpu.vector_store %arg6[%c0_30, %c0_31], %54 {strides = array<i32>} : memref<16x128xf32, #tpu.memory_space<vmem>>, vector<16x128xf32>,
    } else {
    }
    %c0_i32_12 = arith.constant 0 : i32
    %18 = arith.cmpi eq, %arg1, %c0_i32_12 : i32
    %19 = arith.extui %18 : i1 to i32
    %c0_i32_13 = arith.constant 0 : i32
    %20 = arith.cmpi ne, %19, %c0_i32_13 : i32
    scf.if %20 {
      %cst_27 = arith.constant 0xFF800000 : f32
      %52 = vector.broadcast %cst_27 : f32 to vector<16x1xf32>
      %53 = arith.index_cast %arg2 : i32 to index
      %c0_28 = arith.constant 0 : index
      %c0_29 = arith.constant 0 : index
      %54 = vector.load %arg8[%53, %c0_28, %c0_29] : memref<3x16x1xf32, #tpu.memory_space<vmem>>, vector<1x16x1xf32>
      %55 = vector.shape_cast %54 : vector<1x16x1xf32> to vector<16x1xf32>
      %56 = vector.shape_cast %52 : vector<16x1xf32> to vector<1x16x1xf32>
      tpu.vector_store %arg8[%53, %c0_28, %c0_29], %56 {strides = array<i32>} : memref<3x16x1xf32, #tpu.memory_space<vmem>>, vector<1x16x1xf32>,
      %cst_30 = arith.constant 0.000000e+00 : f32
      %57 = vector.broadcast %cst_30 : f32 to vector<16x1xf32>
      %58 = arith.index_cast %arg2 : i32 to index
      %c0_31 = arith.constant 0 : index
      %c0_32 = arith.constant 0 : index
      %59 = vector.load %arg9[%58, %c0_31, %c0_32] : memref<3x16x1xf32, #tpu.memory_space<vmem>>, vector<1x16x1xf32>
      %60 = vector.shape_cast %59 : vector<1x16x1xf32> to vector<16x1xf32>
      %61 = vector.shape_cast %57 : vector<16x1xf32> to vector<1x16x1xf32>
      tpu.vector_store %arg9[%58, %c0_31, %c0_32], %61 {strides = array<i32>} : memref<3x16x1xf32, #tpu.memory_space<vmem>>, vector<1x16x1xf32>,
    } else {
    }
    %21 = arith.index_cast %arg2 : i32 to index
    %c0_14 = arith.constant 0 : index
    %c0_15 = arith.constant 0 : index
    %22 = vector.load %arg8[%21, %c0_14, %c0_15] : memref<3x16x1xf32, #tpu.memory_space<vmem>>, vector<1x16x1xf32>
    %23 = vector.shape_cast %22 : vector<1x16x1xf32> to vector<16x1xf32>
    %cst_16 = arith.constant dense<0xFF800000> : vector<16xf32>
    %24 = vector.multi_reduction <maximumf>, %8, %cst_16 [1] : vector<16x128xf32> to vector<16xf32>
    %25 = vector.shape_cast %24 : vector<16xf32> to vector<16x1xf32>
    %26 = arith.maximumf %23, %25 : vector<16x1xf32>
    %27 = arith.index_cast %arg2 : i32 to index
    %c0_17 = arith.constant 0 : index
    %c0_18 = arith.constant 0 : index
    %28 = vector.load %arg9[%27, %c0_17, %c0_18] : memref<3x16x1xf32, #tpu.memory_space<vmem>>, vector<1x16x1xf32>
    %29 = vector.shape_cast %28 : vector<1x16x1xf32> to vector<16x1xf32>
    %30 = arith.subf %23, %26 : vector<16x1xf32>
    %31 = math.exp %30 : vector<16x1xf32>
    %32 = arith.mulf %29, %31 : vector<16x1xf32>
    %33 = vector.broadcast %26 : vector<16x1xf32> to vector<16x128xf32>
    %34 = arith.subf %8, %33 : vector<16x128xf32>
    %35 = math.exp %34 : vector<16x128xf32>
    %cst_19 = arith.constant dense<0.000000e+00> : vector<16xf32>
    %36 = vector.multi_reduction <add>, %35, %cst_19 [1] : vector<16x128xf32> to vector<16xf32>
    %37 = vector.shape_cast %36 : vector<16xf32> to vector<16x1xf32>
    %38 = arith.addf %32, %37 : vector<16x1xf32>
    %39 = arith.index_cast %arg2 : i32 to index
    %c0_20 = arith.constant 0 : index
    %c0_21 = arith.constant 0 : index
    %40 = vector.load %arg9[%39, %c0_20, %c0_21] : memref<3x16x1xf32, #tpu.memory_space<vmem>>, vector<1x16x1xf32>
    %41 = vector.shape_cast %40 : vector<1x16x1xf32> to vector<16x1xf32>
    %42 = vector.shape_cast %38 : vector<16x1xf32> to vector<1x16x1xf32>
    tpu.vector_store %arg9[%39, %c0_20, %c0_21], %42 {strides = array<i32>} : memref<3x16x1xf32, #tpu.memory_space<vmem>>, vector<1x16x1xf32>,
    %43 = arith.index_cast %arg2 : i32 to index
    %c0_22 = arith.constant 0 : index
    %c0_23 = arith.constant 0 : index
    %44 = vector.load %arg8[%43, %c0_22, %c0_23] : memref<3x16x1xf32, #tpu.memory_space<vmem>>, vector<1x16x1xf32>
    %45 = vector.shape_cast %44 : vector<1x16x1xf32> to vector<16x1xf32>
    %46 = vector.shape_cast %26 : vector<16x1xf32> to vector<1x16x1xf32>
    tpu.vector_store %arg8[%43, %c0_22, %c0_23], %46 {strides = array<i32>} : memref<3x16x1xf32, #tpu.memory_space<vmem>>, vector<1x16x1xf32>,
    %c0_i32_24 = arith.constant 0 : i32
    %47 = arith.cmpi eq, %arg1, %c0_i32_24 : i32
    %c2_i32_25 = arith.constant 2 : i32
    %48 = arith.cmpi eq, %arg2, %c2_i32_25 : i32
    %49 = arith.andi %47, %48 : i1
    %50 = arith.extui %49 : i1 to i32
    %c0_i32_26 = arith.constant 0 : i32
    %51 = arith.cmpi ne, %50, %c0_i32_26 : i32
    scf.if %51 {
      %c0_27 = arith.constant 0 : index
      %c0_28 = arith.constant 0 : index
      %c0_29 = arith.constant 0 : index
      %52 = vector.load %arg8[%c0_27, %c0_28, %c0_29] : memref<3x16x1xf32, #tpu.memory_space<vmem>>, vector<3x16x1xf32>
      %c0_30 = arith.constant 0 : index
      %c0_31 = arith.constant 0 : index
      %c0_32 = arith.constant 0 : index
      %53 = vector.load %arg9[%c0_30, %c0_31, %c0_32] : memref<3x16x1xf32, #tpu.memory_space<vmem>>, vector<3x16x1xf32>
      %54 = math.log %53 : vector<3x16x1xf32>
      %55 = arith.addf %52, %54 : vector<3x16x1xf32>
      %cst_33 = arith.constant dense<0.000000e+00> : vector<16x1xf32>
      %56 = vector.multi_reduction <add>, %55, %cst_33 [0] : vector<3x16x1xf32> to vector<16x1xf32>
      %cst_34 = arith.constant 0.333333343 : f32
      %57 = vector.broadcast %cst_34 : f32 to vector<16x1xf32>
      %58 = arith.mulf %56, %57 : vector<16x1xf32>
      %c0_35 = arith.constant 0 : index
      %c0_36 = arith.constant 0 : index
      %59 = vector.load %arg7[%c0_35, %c0_36] : memref<16x1xf32, #tpu.memory_space<vmem>>, vector<16x1xf32>
      tpu.vector_store %arg7[%c0_35, %c0_36], %58 {strides = array<i32>} : memref<16x1xf32, #tpu.memory_space<vmem>>, vector<16x1xf32>,
    } else {
    }
    return
  }
  func.func @transform_0(%arg0: i32, %arg1: i32, %arg2: i32) -> (i32, i32, i32) {
    %c0_i32 = arith.constant 0 : i32
    %c0_i32_0 = arith.constant 0 : i32
    return %arg2, %arg0, %c0_i32 : i32, i32, i32
  }
  func.func @transform_1(%arg0: i32, %arg1: i32, %arg2: i32) -> (i32, i32, i32) {
    %c0_i32 = arith.constant 0 : i32
    %c0_i32_0 = arith.constant 0 : i32
    return %arg2, %c0_i32, %arg1 : i32, i32, i32
  }
  func.func @transform_2(%arg0: i32, %arg1: i32, %arg2: i32) -> (i32, i32, i32) {
    %c0_i32 = arith.constant 0 : i32
    %c0_i32_0 = arith.constant 0 : i32
    return %arg2, %c0_i32, %arg1 : i32, i32, i32
  }
  func.func @transform_3(%arg0: i32, %arg1: i32, %arg2: i32) -> (i32, i32) {
    %c0_i32 = arith.constant 0 : i32
    return %arg0, %arg1 : i32, i32
  }
  func.func @transform_4(%arg0: i32, %arg1: i32, %arg2: i32) -> (i32, i32) {
    %c0_i32 = arith.constant 0 : i32
    %c0_i32_0 = arith.constant 0 : i32
    return %arg0, %c0_i32 : i32, i32
  }
}

</mosaic_0001>

<bundles_post_ra>
// kernel: ensemble_generator.1
= control target key start
LH: loop header
LB: loop body
LE: loop exit
PB: predicated region body
PF: predicated region fallthrough
CT: control target
= control target key end

     0   :  { %10 = vsyncpa [#allocation5], 0  ;;  %s1136_s0 = inlined_call_operand.hbm [shape: bf16[3,16,32], index: 0, kind: input, shape index: {}]   ;;  %s1137_s1 = inlined_call_operand.hbm [shape: bf16[3,32,128], index: 1, kind: input, shape index: {}]   ;;  %s1138_s2 = inlined_call_operand.vmem [shape: f32[3,1,128], index: 2, kind: input, shape index: {}]   ;;  %s1139_s3 = inlined_call_operand.vmem [shape: f32[16,128], index: 3, kind: output, shape index: {0}]   ;;  %s1140_s4 = inlined_call_operand.vmem [shape: f32[16,1], index: 4, kind: output, shape index: {1}]  }
   0x1   :  { %12 = vsyncpa [#allocation5 + $0x1], 0 }
   0x2   :  { %13 = vsyncpa [#allocation7], 0 }
   0x3   :  { %15 = vsyncpa [#allocation7 + $0x1], 0  ;;  %s959_s15 = smov 0   ;;  %s961_s16 = smov 0  }
   0x4   :  { %s963_s17 = smov 0   ;;  %s965_s18 = smov 0  }
   0x5   :  { %s967_s19 = smov 0   ;;  %s969_s20 = smov 0  }
   0x6 LB: > { %s682_s21 = sadd.s32 4294967295, %s927_s20   ;;  %s33_s22 = sadd.s32 1, %s923_s19  ;;  %s927_s20 = sphi %s969_s20, %s21_s20   ;;  %s923_s19 = sphi %s967_s19, %s1148_s19   ;;  %s919_s18 = sphi %s965_s18, %s1147_s18   ;;  %s915_s17 = sphi %s963_s17, %s1146_s17   ;;  %s911_s16 = sphi %s961_s16, %s1145_s16   ;;  %s907_s15 = sphi %s959_s15, %s1144_s15  }
   0x7   : > { %p34_p0 = scmp.ge.s32.totalorder %s33_s22, 3  ;;  %s49_s23 = sadd.s32 1, %s915_s17 }
   0x8   : > { %p56_p1 = scmp.ne.s32.totalorder %s915_s17, %s911_s16  ;;  %p57_p2 = scmp.eq.s32.totalorder %s927_s20, 0 }
   0x9   : > { %s1150_s22 = smov (%p34_p0, %s33_s22), 0  ;;  %p62_p4 = scmp.ne.s32.totalorder %s911_s16, %s907_s15 }
   0xa   : > { %p995_p3 = por %p57_p2, %p56_p1  ;;  %s44_s25 = ssub.s32 %s923_s19, %s1150_s22 }
   0xb   : > { %p63_p5 = scmp.eq.s32.totalorder %s682_s21, 0  ;;  %p47_p6 = scmp.eq.s32.totalorder %s44_s25, 0 }
   0xc   : > { %p736_p8 = scmp.lt.s32.totalorder %s927_s20, 3  ;;  %s1011_s28 = sand.u32 1, %s915_s17  }
   0xd   : > { %p1002_p7 = por %p63_p5, %p62_p4  ;;  %s719_s29 = sshll.u32 %s923_s19, 3 }
   0xe   : > { %s1008_s27 = scalar_select %p47_p6, %s915_s17, %s49_s23  }
   0xf   : > { %s685_s30 = sshll.u32 %s1011_s28, 3  ;;  %s207_s7 = scalar_lea.hbm %s1136_s0, %s719_s29 }
  0x10   : > { %s208_s8 = sshll.u32 %s207_s7, 4  ;;  %s200_s9 = scalar_lea.vmem [#allocation4], %s685_s30  ;;  %s209_s8 = int_to_ptr.hbm [resolvable:$true] %s208_s8 }
  0x11   : > { %s210_s10 = sshll.u32 %s200_s9, 4  ;;  %p1020_p9 = pnand %p736_p8, %p995_p3  ;;  %s211_s10 = int_to_ptr.vmem [resolvable:$true] %s210_s10 }
  0x12   : > { %p691_p10 = scmp.ge.s32.totalorder %s927_s20, 1  ;;  %p250_p11 = scmp.lt.s32.totalorder %s927_s20, 4 }
  0x13   : > { %s197_s12 = scalar_lea.sflag [#allocation5], %s1011_s28  ;;  %s929_s13 = smov 64  }
  0x14   : > { %s930_s14 = smov 4   ;;  %p251_p12 = pnand %p691_p10, %p250_p11 }
  0x15   : > { %732 = dma.hbm_to_vmem [thread:$0]  (!%p1020_p9), %s209_s8, 128, %s211_s10, %s197_s12, %s929_s13, %s929_s13, %s930_s14  }
  0x16   : > { %s688_s15 = sshll.u32 %s1011_s28, 4  ;;  %s720_s21 = sshll.u32 %s923_s19, 4 }
  0x17   : > { %s230_s24 = scalar_lea.hbm %s1137_s1, %s720_s21  ;;  %s224_s30 = scalar_lea.vmem [#allocation6], %s688_s15 }
  0x18   : > { %s231_s29 = sshll.u32 %s230_s24, 4  ;;  %s233_s5 = sshll.u32 %s224_s30, 4  ;;  %s232_s29 = int_to_ptr.hbm [resolvable:$true] %s231_s29  ;;  %s234_s5 = int_to_ptr.vmem [resolvable:$true] %s233_s5 }
  0x19   : > { %s221_s6 = scalar_lea.sflag [#allocation7], %s1011_s28  ;;  %254 = sbr.rel (%p251_p12) target bundleno = 604 (0x25c), region = 32 }
  0x1a   : > { %735 = dma.hbm_to_vmem [thread:$0]  (!%p1020_p9), %s232_s29, 256, %s234_s5, %s221_s6, %s929_s13, %s929_s13, %s930_s14  }
  0x1b   : > { %s256_s7 = sand.u32 (!%p251_p12), 1, %s911_s16  }
  0x1c   : > { %s692_s8 = sshll.u32 (!%p251_p12), %s256_s7, 3  ;;  %s257_s9 = scalar_lea.sflag (!%p251_p12), [#allocation5], %s256_s7 }
  0x1d   : > { %s260_s10 = scalar_lea.vmem (!%p251_p12), [#allocation4], %s692_s8 }
  0x1e   : > { %898 = dma.done.wait (%p1002_p7), %s257_s9, 128  }
  0x1f   : > { %900 = vsyncadd (%p1002_p7), %s257_s9, 4294967168  ;;  %s693_s12 = sshll.u32 %s256_s7, 4  ;;  %s267_s15 = scalar_lea.sflag [#allocation7], %s256_s7 }
  0x20   : > { %s270_s21 = scalar_lea.vmem [#allocation6], %s693_s12 }
  0x21   : > { %902 = dma.done.wait (%p1002_p7), %s267_s15, 256  }
  0x22   : > { %904 = vsyncadd (%p1002_p7), %s267_s15, 4294967040  ;;  %p316_p13 = scmp.lt.s32.totalorder %s919_s18, 2  ;;  %v723_v0 = vld [vmem:[%s270_s21 + $0x8] sm:$0xff]  ;;  %v722_v1 = vld [vmem:[%s270_s21] sm:$0xff]  ;;  %vm365_vm0 = vcmask 261120   ;;  %p707_p0 = scmp.ne.s32.totalorder %s919_s18, 0 }
  0x23   : > { %375 = vmatpush.bf16.msra.mxu0 %v723_v0  ;;  %v721_v2 = vld [vmem:[%s260_s10] sm:$0xff] }
  0x24   : > { %s317_s28 = scalar_select %p316_p13, %s919_s18, 2 }
  0x26   : > { %s321_s14 = scalar_lea.vmem %s1138_s2, %s317_s28 }
  0x27   : > { %376 = vmatpush.bf16.msra.mxu0 %v722_v1  ;;  %v790_v3 = vld [vmem:[%s321_s14] ss:$0 sm:$0xff] }
  0x2a   : > { %706 = vmatmul.msk.bf16.vlgmr.msra.gmra.mxu0 %vm365_vm0, %v721_v2 }
  0xa7   : > { %v378_v4 = vpop.f32.mrf.mxu0 }
  0xa8   : > { %v379_v5 = vadd.f32 %v790_v3, %v378_v4 }
  0xac   : > { %386 = sbr.rel (%p707_p0) target bundleno = 179 (0xb3), region = 44 }
  0xaf   : > { %v380_v6 = vpop.f32.mrf.mxu0 }
  0xb0   : > { %v381_v7 = vadd.f32 %v790_v3, %v380_v6 }
  0xb1   : > { %387 = vst [vmem:[%s1139_s3] sm:$0xff] %v379_v5 }
  0xb2   : > { %388 = vst [vmem:[%s1139_s3 + $0x8] sm:$0xff] %v381_v7 }
  0xb3 PF: > { %p708_p1 = scmp.le.s32.totalorder %s919_s18, 0 }
  0xb5   : > { %392 = sbr.rel (%p708_p1) target bundleno = 191 (0xbf), region = 48 }
  0xba   : > { %v393_v8 = vld [vmem:[%s1139_s3] sm:$0xff]  ;;  %v394_v9 = vld [vmem:[%s1139_s3 + $0x8] sm:$0xff] }
  0xbb   : > { %v395_v10 = vadd.f32 %v393_v8, %v379_v5  ;;  %v396_v11 = vadd.f32 %v394_v9, %v381_v7 }
  0xbd   : > { %397 = vst [vmem:[%s1139_s3] sm:$0xff] %v395_v10 }
  0xbe   : > { %398 = vst [vmem:[%s1139_s3 + $0x8] sm:$0xff] %v396_v11 }
  0xbf PF: > { %p399_p2 = scmp.eq.s32.totalorder %s919_s18, 2  ;;  %p709_p3 = scmp.ne.s32.totalorder %s919_s18, 2 }
  0xc1   : > { %402 = sbr.rel (%p709_p3) target bundleno = 203 (0xcb), region = 52 }
  0xc6   : > { %v403_v12 = vld [vmem:[%s1139_s3] sm:$0xff]  ;;  %v404_v13 = vld [vmem:[%s1139_s3 + $0x8] sm:$0xff] }
  0xc7   : > { %v405_v14 = vmul.f32 0.33333334, %v403_v12  ;;  %v406_v15 = vmul.f32 0.33333334, %v404_v13 }
  0xc9   : > { %407 = vst [vmem:[%s1139_s3] sm:$0xff] %v405_v14 }
  0xca   : > { %408 = vst [vmem:[%s1139_s3 + $0x8] sm:$0xff] %v406_v15 }
  0xcb PF: > { %425 = vmax.xlane.f32.xlu0 %v379_v5  ;;  %s710_s23 = sshll.u32 %s919_s18, 4  ;;  %vm415_vm1 = vcmask 7168   ;;  %v931_v16 = vmov -inf   ;;  %v932_v17 = vmov 0   ;;  %v933_v18 = vmov 0.0  }
  0xcc   : > { %s414_s25 = scalar_lea.vmem [#allocation2], %s710_s23  ;;  %791 = vset.pattern.permute.xlu1 %v932_v17  ;;  %792 = vset.pattern.permute.xlu0 %v932_v17  ;;  %s1088_s24 = scalar_lea.vmem [#allocation3], %s710_s23 }
  0xcd   : > { %416 = vst.msk [vmem:[%s414_s25] sm:$0xff] %vm415_vm1, %v931_v16 }
  0xce   : > { %417 = vst.msk [vmem:[%s414_s25 + $0x8] sm:$0xff] %vm415_vm1, %v931_v16 }
  0xcf   : > { %419 = vst.msk [vmem:[%s1088_s24] sm:$0xff] %vm415_vm1, %v933_v18 }
  0xd0   : > { %420 = vst.msk [vmem:[%s1088_s24 + $0x8] sm:$0xff] %vm415_vm1, %v933_v18 }
  0xd3   : > { %427 = vmax.xlane.f32.xlu0 %v381_v7 }
  0xd4   : > { %v423_v19 = vld [vmem:[%s414_s25] sm:$0xff] }
  0xd5   : > { %v424_v23 = vld [vmem:[%s414_s25 + $0x8] sm:$0xff] }
  0xd6   : > { %v432_v38 = vld [vmem:[%s1088_s24] sm:$0xff] }
  0xd7   : > { %v433_v43 = vld [vmem:[%s1088_s24 + $0x8] sm:$0xff] }
 0x13e   : > { %v426_v20 = vpop.xlane.xlu0 %425 }
 0x13f   : > { %v429_v21 = vmax.f32 %v423_v19, %v426_v20 }
 0x141   : > { %v434_v22 = vsub.f32 %v423_v19, %v429_v21  ;;  %467 = vst.msk [vmem:[%s414_s25] sm:$0xff] %vm415_vm1, %v429_v21  ;;  %444 = vperm.xlu1 %791, %v429_v21  }
 0x143   : > { %v436_v35 = vmul.f32 1.442695, %v434_v22 }
 0x146   : > { %v428_v24 = vpop.xlane.xlu0 %427 }
 0x147   : > { %v430_v25 = vmax.f32 %v424_v23, %v428_v24 }
 0x149   : > { %v435_v26 = vsub.f32 %v424_v23, %v430_v25  ;;  %468 = vst.msk [vmem:[%s414_s25 + $0x8] sm:$0xff] %vm415_vm1, %v430_v25  ;;  %449 = vperm.xlu1 %791, %v430_v25  }
 0x14b   : > { %v438_v36 = vmul.f32 1.442695, %v435_v26 }
 0x150   : > { %v473_v54 = vld [vmem:[#allocation2] sm:$0xff] (%p399_p2)  ;;  %v475_v56 = vld [vmem:[#allocation2 + $0x10] sm:$0xff] (%p399_p2)  ;;  %v474_v0 = vld [vmem:[#allocation2 + $0x8] sm:$0xff] (%p399_p2) }
 0x151   : > { %v477_v59 = vld [vmem:[#allocation2 + $0x20] sm:$0xff] (%p399_p2)  ;;  %v476_v3 = vld [vmem:[#allocation2 + $0x18] sm:$0xff] (%p399_p2)  ;;  %v478_v8 = vld [vmem:[#allocation2 + $0x28] sm:$0xff] (%p399_p2) }
 0x1b3   : > { %v445_v27 = vpop.permute.xlu1 %444 }
 0x1b4   : > { %v452_v28 = vsub.f32 %v379_v5, %v445_v27 }
 0x1b6   : > { %v454_v29 = vmul.f32 1.442695, %v452_v28 }
 0x1b8   : > { %793 = vpow2.f32 %v454_v29 }
 0x1bb   : > { %v450_v30 = vpop.permute.xlu1 %449 }
 0x1bc   : > { %v453_v31 = vsub.f32 %v381_v7, %v450_v30 }
 0x1be   : > { %v794_v32 = vpop.eup %793  ;;  %v456_v33 = vmul.f32 1.442695, %v453_v31 }
 0x1bf   : > { %458 = vadd.xlane.f32.xlu2 %v794_v32 }
 0x1c0   : > { %795 = vpow2.f32 %v456_v33 }
 0x1c1   : > { %797 = vpow2.f32 %v436_v35 }
 0x1c2   : > { %799 = vpow2.f32 %v438_v36 }
 0x1c6   : > { %v796_v34 = vpop.eup %795 }
 0x1c7   : > { %460 = vadd.xlane.f32.xlu2 %v796_v34  ;;  %v798_v37 = vpop.eup %797 }
 0x1c8   : > { %v440_v39 = vmul.f32 %v798_v37, %v432_v38  ;;  %v800_v42 = vpop.eup %799 }
 0x1c9   : > { %v441_v44 = vmul.f32 %v800_v42, %v433_v43 }
 0x232   : > { %v459_v40 = vpop.xlane.xlu2 %458 }
 0x233   : > { %v462_v41 = vadd.f32 %v459_v40, %v440_v39 }
 0x235   : > { %465 = vst.msk [vmem:[%s1088_s24] sm:$0xff] %vm415_vm1, %v462_v41 }
 0x239   : > { %472 = sbr.rel (!%p399_p2) target bundleno = 604 (0x25c), region = 60 }
 0x23a   : > { %v461_v45 = vpop.xlane.xlu2 %460 }
 0x23b   : > { %v463_v46 = vadd.f32 %v461_v45, %v441_v44 }
 0x23d   : > { %466 = vst.msk [vmem:[%s1088_s24 + $0x8] sm:$0xff] %vm415_vm1, %v463_v46 }
 0x244   : > { %v479_v47 = vld [vmem:[#allocation3] sm:$0xff]  ;;  %v481_v48 = vld [vmem:[#allocation3 + $0x10] sm:$0xff]  ;;  %v480_v50 = vld [vmem:[#allocation3 + $0x8] sm:$0xff] }
 0x245   : > { %v483_v49 = vld [vmem:[#allocation3 + $0x20] sm:$0xff]  ;;  %801 = vlog2.f32 %v479_v47  ;;  %v482_v51 = vld [vmem:[#allocation3 + $0x18] sm:$0xff]  ;;  %v484_v52 = vld [vmem:[#allocation3 + $0x28] sm:$0xff] }
 0x246   : > { %803 = vlog2.f32 %v481_v48 }
 0x247   : > { %805 = vlog2.f32 %v483_v49 }
 0x248   : > { %807 = vlog2.f32 %v480_v50 }
 0x249   : > { %809 = vlog2.f32 %v482_v51 }
 0x24a   : > { %811 = vlog2.f32 %v484_v52 }
 0x24b   : > { %v802_v53 = vpop.eup %801 }
 0x24c   : > { %v804_v55 = vpop.eup %803  ;;  %v486_v57 = vmul.f32 0.6931472, %v802_v53 }
 0x24d   : > { %v806_v58 = vpop.eup %805  ;;  %v490_v60 = vmul.f32 0.6931472, %v804_v55 }
 0x24e   : > { %v808_v61 = vpop.eup %807  ;;  %v494_v62 = vmul.f32 0.6931472, %v806_v58  ;;  %v497_v63 = vadd.f32 %v486_v57, %v473_v54 }
 0x24f   : > { %v810_v1 = vpop.eup %809  ;;  %v499_v2 = vadd.f32 %v490_v60, %v475_v56  ;;  %v488_v4 = vmul.f32 0.6931472, %v808_v61 }
 0x250   : > { %v812_v5 = vpop.eup %811  ;;  %v501_v6 = vadd.f32 %v494_v62, %v477_v59  ;;  %v503_v7 = vsel %vm415_vm1, %v497_v63, 0.0  ;;  %v492_v9 = vmul.f32 0.6931472, %v810_v1 }
 0x251   : > { %v504_v10 = vsel %vm415_vm1, %v499_v2, 0.0  ;;  %v496_v11 = vmul.f32 0.6931472, %v812_v5  ;;  %v498_v12 = vadd.f32 %v488_v4, %v474_v0 }
 0x252   : > { %v505_v13 = vadd.f32 %v504_v10, %v503_v7  ;;  %v506_v14 = vsel %vm415_vm1, %v501_v6, 0.0  ;;  %v500_v15 = vadd.f32 %v492_v9, %v476_v3 }
 0x253   : > { %v502_v16 = vadd.f32 %v496_v11, %v478_v8  ;;  %v508_v17 = vsel %vm415_vm1, %v498_v12, 0.0 }
 0x254   : > { %v507_v18 = vadd.f32 %v506_v14, %v505_v13  ;;  %v509_v19 = vsel %vm415_vm1, %v500_v15, 0.0 }
 0x255   : > { %v510_v20 = vadd.f32 %v509_v19, %v508_v17  ;;  %v511_v21 = vsel %vm415_vm1, %v502_v16, 0.0 }
 0x256   : > { %v513_v22 = vmul.f32 0.33333334, %v507_v18 }
 0x257   : > { %v512_v23 = vadd.f32 %v511_v21, %v510_v20 }
 0x258   : > { %515 = vst.msk [vmem:[%s1140_s4] sm:$0xff] %vm415_vm1, %v513_v22 }
 0x259   : > { %v514_v24 = vmul.f32 0.33333334, %v512_v23 }
 0x25b   : > { %516 = vst.msk [vmem:[%s1140_s4 + $0x8] sm:$0xff] %vm415_vm1, %v514_v24 }
 0x25c PF: > { %s21_s20 = sadd.s32 1, %s927_s20   ;;  %s1144_s15 = smov %s911_s16 }
 0x25d   : > { %p18_p4 = scmp.ge.s32.totalorder %s21_s20, 5   ;;  %s1145_s16 = smov %s915_s17 }
 0x25e   : > { %s1146_s17 = smov %s1008_s27  ;;  %s1147_s18 = smov %s923_s19 }
 0x25f   : > { %s1148_s19 = smov %s1150_s22  ;;  %20 = sbr.rel (!%p18_p4) target bundleno = 6 (0x6), region = 124 }
 0x264   :  { %562 = vsyncpa [#allocation5], 1 }
 0x265   :  { %564 = vsyncpa [#allocation5 + $0x1], 1 }
 0x266   :  { %565 = vsyncpa [#allocation7], 1 }
 0x267   :  { %567 = vsyncpa [#allocation7 + $0x1], 1 }

</bundles_post_ra>
